<compile_context>
chip_gen: v5e
topology: v5e:2x2
jax: 0.10.0
libtpu: 0.0.40
codegen_flags: <defaults>
</compile_context>

<pallas_src>
import functools

import numpy as np

import jax
import jax.numpy as jnp
from jax.experimental import pallas as pl
from jax.experimental.pallas import tpu as pltpu

_LANES = 128  # lane-dense output slab width


def _round_up(x, m):
    return ((x + m - 1) // m) * m


def _knn_kernel(q_ref, qn_ref, c_ref, cn_ref, dist_ref, idx_ref, best_d, best_i,
                *, k, tm, tn, chunk):
    """One (group g, query-tile i, candidate-tile j) step of streaming self-KNN.

    q_ref   : (tm, Dp)  f32  -- query rows of group g, tile i
    qn_ref  : (tm, 1)   f32  -- precomputed query squared norms (no per-step recompute)
    c_ref   : (tn, Dp)  f32  -- candidate rows of group g, tile j (streamed)
    cn_ref  : (1, tn)   f32  -- candidate squared norms; padded rows carry +inf
    dist_ref: (tm, 128) f32  -- lanes [0,k): final best distances (ascending)
    idx_ref : (tm, 128) i32  -- lanes [0,k): matching row indices within the group
    best_d/best_i : VMEM scratch holding the running top-k across candidate tiles
    """
    i = pl.program_id(1)          # query-row tile   ("parallel")
    j = pl.program_id(2)          # candidate tile   ("arbitrary" reduction axis)
    nj = pl.num_programs(2)
    row_base = i * tm
    col_base = j * tn

    @pl.when(j == 0)
    def _init():
        best_d[...] = jnp.full((tm, _LANES), jnp.inf, jnp.float32)
        best_i[...] = jnp.zeros((tm, _LANES), jnp.int32)

    q = q_ref[...].astype(jnp.bfloat16)      # bf16 feeds the MXU (f32 accumulation)
    qn = qn_ref[...]                         # (tm, 1) f32

    BIG = jnp.int32(2 ** 30)
    INF = jnp.float32(jnp.inf)

    # Column-chunked epilogue: each chunk is <= 128 lanes so the selection loop's live
    # set (distances + local column iota) stays register-resident.
    for c_idx in range(tn // chunk):
        c0 = c_idx * chunk
        col_off = col_base + c0

        c = c_ref[c0:c0 + chunk, :].astype(jnp.bfloat16)    # (chunk, Dp)
        cn = cn_ref[:, c0:c0 + chunk]                       # (1, chunk), +inf on padding

        # Pairwise squared-L2 via the Gram identity (MXU matmul).
        g = jax.lax.dot_general(q, c, (((1,), (1,)), ((), ())),
                                preferred_element_type=jnp.float32)   # (tm, chunk)
        d = jnp.maximum(qn + cn - 2.0 * g, 0.0)

        col_l = jax.lax.broadcasted_iota(jnp.int32, (tm, chunk), 1)
        row_l = jax.lax.broadcasted_iota(jnp.int32, (tm, chunk), 0)
        # Exact self-distance: row_base + row_l == col_off + col_l.
        d = jnp.where((row_l - col_l) == (col_off - row_base), 0.0, d)

        # --- chunk-local top-k (ascending, lowest column index on ties) ---
        tile_d, tile_i = [], []
        dcur = d
        for _ in range(k):                                  # k small & static
            vmin = jnp.min(dcur, axis=1, keepdims=True)     # (tm, 1)
            amin = jnp.min(jnp.where(dcur == vmin, col_l, BIG), axis=1, keepdims=True)
            tile_d.append(vmin)
            tile_i.append(amin + col_off)                   # local -> group-global index
            dcur = jnp.where(col_l == amin, INF, dcur)
        tile_d = jnp.concatenate(tile_d, axis=1)            # (tm, k)
        tile_i = jnp.concatenate(tile_i, axis=1)            # (tm, k)

        def _store_direct(td=tile_d, ti=tile_i):
            best_d[:, :k] = td
            best_i[:, :k] = ti

        def _merge(td=tile_d, ti=tile_i):
            run_d = best_d[:, :k]
            run_i = best_i[:, :k]
            cand_d = jnp.concatenate([run_d, td], axis=1)   # (tm, 2k)
            cand_i = jnp.concatenate([run_i, ti], axis=1)
            pos = jax.lax.broadcasted_iota(jnp.int32, cand_d.shape, 1)
            nd, ni = [], []
            cd = cand_d
            for _ in range(k):
                vmin = jnp.min(cd, axis=1, keepdims=True)
                pmin = jnp.min(jnp.where(cd == vmin, pos, BIG), axis=1, keepdims=True)
                sel = jnp.sum(jnp.where(pos == pmin, cand_i, 0), axis=1, keepdims=True)
                nd.append(vmin)
                ni.append(sel)
                cd = jnp.where(pos == pmin, INF, cd)
            best_d[:, :k] = jnp.concatenate(nd, axis=1)
            best_i[:, :k] = jnp.concatenate(ni, axis=1)

        if c_idx == 0:
            # Running list is empty on the first candidate tile: skip the merge.
            pl.when(j == 0)(_store_direct)
            pl.when(j > 0)(_merge)
        else:
            _merge()

    # Single unmasked lane-dense writeback per (g, i) on the last candidate tile.
    @pl.when(j == nj - 1)
    def _writeback():
        dist_ref[...] = best_d[...]
        idx_ref[...] = best_i[...]


def _batched_self_knn(emb_list, k):
    """Batched self-KNN over a list of (n_g, D) float arrays with a single pallas_call.

    Returns (dist, idx) slabs of shape (G, n_pad, 128); slice [:n_g, :k_g] per group.
    """
    G = len(emb_list)
    D = int(emb_list[0].shape[1])
    n_max = max(int(e.shape[0]) for e in emb_list)
    d_pad = _round_up(max(D, 1), 128)

    if n_max <= 128:
        n_pad = max(8, _round_up(n_max, 8))     # tile-multiple padding, not next_pow2
        tm = tn = n_pad
    else:
        n_pad = _round_up(n_max, 128)
        tn = 512 if n_pad % 512 == 0 else (256 if n_pad % 256 == 0 else 128)
        # Bound the double-buffered candidate tile (<= ~8 MiB) so large embed dims also
        # fit v7x's 64 MiB VMEM.
        while tn > 128 and 2 * tn * d_pad * 4 > 8 * 1024 * 1024:
            tn //= 2
        tm = 128
    chunk = min(tn, 128)
    assert 1 <= k <= chunk and k <= _LANES

    emb_b = jnp.zeros((G, n_pad, d_pad), jnp.float32)
    norms = jnp.full((G, n_pad), jnp.inf, jnp.float32)   # +inf marks padded rows
    for g, e in enumerate(emb_list):
        e = e.astype(jnp.float32)
        n_g = int(e.shape[0])
        emb_b = emb_b.at[g, :n_g, :D].set(e)
        norms = norms.at[g, :n_g].set(jnp.sum(e * e, axis=1))
    qnorm = norms[:, :, None]          # (G, n_pad, 1)  query-row norms
    cnorm = norms[:, None, :]          # (G, 1, n_pad)  candidate norms (+inf padding)

    kernel = functools.partial(_knn_kernel, k=k, tm=tm, tn=tn, chunk=chunk)
    grid = (G, n_pad // tm, n_pad // tn)

    dist, idx = pl.pallas_call(
        kernel,
        out_shape=(jax.ShapeDtypeStruct((G, n_pad, _LANES), jnp.float32),
                   jax.ShapeDtypeStruct((G, n_pad, _LANES), jnp.int32)),
        grid=grid,
        in_specs=[
            pl.BlockSpec((None, tm, d_pad), lambda g, i, j: (g, i, 0)),   # query rows
            pl.BlockSpec((None, tm, 1),     lambda g, i, j: (g, i, 0)),   # query norms
            pl.BlockSpec((None, tn, d_pad), lambda g, i, j: (g, j, 0)),   # candidates
            pl.BlockSpec((None, 1, tn),     lambda g, i, j: (g, 0, j)),   # cand norms
        ],
        out_specs=(pl.BlockSpec((None, tm, _LANES), lambda g, i, j: (g, i, 0)),
                   pl.BlockSpec((None, tm, _LANES), lambda g, i, j: (g, i, 0))),
        scratch_shapes=[pltpu.VMEM((tm, _LANES), jnp.float32),
                        pltpu.VMEM((tm, _LANES), jnp.int32)],
        compiler_params=pltpu.CompilerParams(
            dimension_semantics=("parallel", "parallel", "arbitrary"),
            vmem_limit_bytes=48 * 1024 * 1024),
    )(emb_b, qnorm, emb_b, cnorm)
    return dist, idx


def knn_topk_pallas(embeddings, k):
    """embeddings: (N, D). Returns (distances (N, k) f32, indices (N, k) i32)."""
    n = int(embeddings.shape[0])
    assert 1 <= k <= n
    dist, idx = _batched_self_knn([embeddings], k)
    return dist[0, :n, :k], idx[0, :n, :k]


def deep_feature_knn(embeddings, subset, k, return_distances=False):
    """JAX equivalent of DeepFeatureKNN.forward (default L2 distance).

    As used by DeepFeatureOverload, subset == embeddings (self-KNN).
    """
    # TODO(synk): generic subset != embeddings path not specialized; the module only
    # ever calls this with subset == embeddings.
    assert k > 1, 'k must be greater than 1'
    distances, indices = knn_topk_pallas(embeddings, k)
    matches = embeddings[indices]                      # (N, k, D) gather (JAX glue)
    if return_distances:
        return matches, distances
    return matches


def deep_feature_overload(x, labels, embeddings, k_dict, logits=None):
    """JAX equivalent of DeepFeatureOverload.forward."""
    # TODO(synk): host-side label grouping (python dict loop) has no Pallas equivalent;
    # it mirrors the original module's CPU loop, but all groups share ONE pallas_call.
    batch_size = x.shape[0]
    labels_np = np.asarray(labels).reshape(batch_size, -1)

    groups = {}
    order = []
    for i in range(batch_size):
        yi = int(np.squeeze(labels_np[i]))
        if yi not in groups:
            groups[yi] = {'x': [], 'embeddings': []}
            if logits is not None:
                groups[yi]['logits'] = []
            order.append(yi)
        groups[yi]['x'].append(x[i])
        groups[yi]['embeddings'].append(embeddings[i])
        if logits is not None:
            groups[yi]['logits'].append(logits[i])

    for yi in groups:
        groups[yi]['x'] = jnp.stack(groups[yi]['x'], axis=0)
        groups[yi]['embeddings'] = jnp.stack(groups[yi]['embeddings'], axis=0)
        if logits is not None:
            groups[yi]['logits'] = jnp.stack(groups[yi]['logits'], axis=0)

    # Partition groups: KNN path vs. fallback path.
    knn_items = []
    for yi in order:
        k = k_dict[yi] if yi in k_dict else 0
        emb_g = groups[yi]['embeddings']
        n_g = int(emb_g.shape[0])
        if 0 < k <= n_g:
            assert k > 1, 'k must be greater than 1'
            knn_items.append((yi, n_g, k))
        else:
            groups[yi]['neighbors'] = emb_g[:, None, ...]                # (n_g, 1, D)
            groups[yi]['distances'] = jnp.zeros((n_g, 1), jnp.float32)   # (n_g, 1)

    if knn_items:
        emb_list = [groups[yi]['embeddings'] for (yi, _, _) in knn_items]
        k_max = max(kk for (_, _, kk) in knn_items)
        # One fused launch for all label groups that need KNN.
        dist_b, idx_b = _batched_self_knn(emb_list, k_max)
        for slot, (yi, n_g, k_g) in enumerate(knn_items):
            idx_g = idx_b[slot, :n_g, :k_g]
            groups[yi]['neighbors'] = groups[yi]['embeddings'][idx_g]    # (n_g, k_g, D)
            groups[yi]['distances'] = dist_b[slot, :n_g, :k_g]           # (n_g, k_g)

    return groups


if __name__ == "__main__":
    key = jax.random.PRNGKey(0)
    kx, ke, kl = jax.random.split(key, 3)

    B, C, H, W, D, NCLS = 8, 4, 16, 16, 32, 10
    x = jax.random.normal(kx, (B, C, H, W), jnp.float32)       # NCHW
    embeddings = jax.random.normal(ke, (B, D), jnp.float32)
    logits = jax.random.normal(kl, (B, NCLS), jnp.float32)
    labels = jnp.array([0, 0, 0, 1, 1, 1, 1, 2], jnp.int32)
    k_dict = {0: 2, 1: 3}                                       # class 2 -> fallback path

    groups = deep_feature_overload(x, labels, embeddings, k_dict, logits=logits)
    groups = jax.block_until_ready(groups)

    # sanity checks
    for yi, g in groups.items():
        n = g['embeddings'].shape[0]
        k = k_dict.get(yi, 0)
        if 0 < k <= n:
            assert g['neighbors'].shape == (n, k, D)
            assert g['distances'].shape == (n, k)
            # nearest neighbor of each point is itself (distance exactly 0)
            assert bool(jnp.all(g['distances'][:, 0] <= 1e-5))
            # distances sorted ascending
            assert bool(jnp.all(jnp.diff(g['distances'], axis=1) >= 0))
            # all distances non-negative
            assert bool(jnp.all(g['distances'] >= 0))
        else:
            assert g['neighbors'].shape == (n, 1, D)
            assert g['distances'].shape == (n, 1)

    print("KERNEL_OK")
</pallas_src>

<mosaic_0001>
module attributes {stable_mosaic.version = 11 : i64} {
  func.func @_knn_kernel(%arg0: i32, %arg1: i32, %arg2: i32, %arg3: memref<1x8x128xf32, #tpu.memory_space<vmem>>, %arg4: memref<1x8x1xf32, #tpu.memory_space<vmem>>, %arg5: memref<1x8x128xf32, #tpu.memory_space<vmem>>, %arg6: memref<1x1x8xf32, #tpu.memory_space<vmem>>, %arg7: memref<1x8x128xf32, #tpu.memory_space<vmem>>, %arg8: memref<1x8x128xi32, #tpu.memory_space<vmem>>, %arg9: memref<8x128xf32, #tpu.memory_space<vmem>>, %arg10: memref<8x128xi32, #tpu.memory_space<vmem>>) attributes {dimension_semantics = [#tpu.dimension_semantics<parallel>, #tpu.dimension_semantics<parallel>, #tpu.dimension_semantics<arbitrary>], iteration_bounds = array<i64: 2, 1, 1>, scalar_prefetch = 0 : i64, scratch_operands = 2 : i64, tpu.core_type = #tpu.core_type<tc>, window_params = [{transform_indices = @transform_0, window_bounds = array<i64: 1, 8, 128>}, {transform_indices = @transform_1, window_bounds = array<i64: 1, 8, 1>}, {transform_indices = @transform_2, window_bounds = array<i64: 1, 8, 128>}, {transform_indices = @transform_3, window_bounds = array<i64: 1, 1, 8>}, {transform_indices = @transform_4, window_bounds = array<i64: 1, 8, 128>}, {transform_indices = @transform_5, window_bounds = array<i64: 1, 8, 128>}]} {
    %c8_i32 = arith.constant 8 : i32
    %0 = arith.muli %arg1, %c8_i32 : i32
    %c8_i32_0 = arith.constant 8 : i32
    %1 = arith.muli %arg2, %c8_i32_0 : i32
    %c0_i32 = arith.constant 0 : i32
    %2 = arith.cmpi eq, %arg2, %c0_i32 : i32
    %3 = arith.extui %2 : i1 to i32
    %c0_i32_1 = arith.constant 0 : i32
    %4 = arith.cmpi ne, %3, %c0_i32_1 : i32
    scf.if %4 {
      %cst_35 = arith.constant 0x7F800000 : f32
      %82 = vector.broadcast %cst_35 : f32 to vector<8x128xf32>
      %c0_36 = arith.constant 0 : index
      %c0_37 = arith.constant 0 : index
      %83 = vector.load %arg9[%c0_36, %c0_37] : memref<8x128xf32, #tpu.memory_space<vmem>>, vector<8x128xf32>
      tpu.vector_store %arg9[%c0_36, %c0_37], %82 {strides = array<i32>} : memref<8x128xf32, #tpu.memory_space<vmem>>, vector<8x128xf32>,
      %c0_i32_38 = arith.constant 0 : i32
      %84 = vector.broadcast %c0_i32_38 : i32 to vector<8x128xi32>
      %c0_39 = arith.constant 0 : index
      %c0_40 = arith.constant 0 : index
      %85 = vector.load %arg10[%c0_39, %c0_40] : memref<8x128xi32, #tpu.memory_space<vmem>>, vector<8x128xi32>
      tpu.vector_store %arg10[%c0_39, %c0_40], %84 {strides = array<i32>} : memref<8x128xi32, #tpu.memory_space<vmem>>, vector<8x128xi32>,
    } else {
    }
    %c0 = arith.constant 0 : index
    %c0_2 = arith.constant 0 : index
    %c0_3 = arith.constant 0 : index
    %5 = vector.load %arg3[%c0, %c0_2, %c0_3] : memref<1x8x128xf32, #tpu.memory_space<vmem>>, vector<1x8x128xf32>
    %6 = vector.shape_cast %5 : vector<1x8x128xf32> to vector<8x128xf32>
    %7 = arith.truncf %6 : vector<8x128xf32> to vector<8x128xbf16>
    %c0_4 = arith.constant 0 : index
    %c0_5 = arith.constant 0 : index
    %c0_6 = arith.constant 0 : index
    %8 = vector.load %arg4[%c0_4, %c0_5, %c0_6] : memref<1x8x1xf32, #tpu.memory_space<vmem>>, vector<1x8x1xf32>
    %9 = vector.shape_cast %8 : vector<1x8x1xf32> to vector<8x1xf32>
    %c0_i32_7 = arith.constant 0 : i32
    %10 = arith.addi %1, %c0_i32_7 : i32
    %c0_8 = arith.constant 0 : index
    %c0_9 = arith.constant 0 : index
    %c0_10 = arith.constant 0 : index
    %11 = vector.load %arg5[%c0_8, %c0_9, %c0_10] : memref<1x8x128xf32, #tpu.memory_space<vmem>>, vector<1x8x128xf32>
    %12 = vector.shape_cast %11 : vector<1x8x128xf32> to vector<8x128xf32>
    %13 = arith.truncf %12 : vector<8x128xf32> to vector<8x128xbf16>
    %c0_11 = arith.constant 0 : index
    %c0_12 = arith.constant 0 : index
    %c0_13 = arith.constant 0 : index
    %14 = vector.load %arg6[%c0_11, %c0_12, %c0_13] : memref<1x1x8xf32, #tpu.memory_space<vmem>>, vector<1x1x8xf32>
    %15 = vector.shape_cast %14 : vector<1x1x8xf32> to vector<1x8xf32>
    %cst = arith.constant dense<0.000000e+00> : vector<8x8xf32>
    %16 = tpu.matmul %7, %13, %cst {dimension_numbers = #tpu.dot_dimension_numbers<[1], [1], [0], [0], [0, 0, 1, 0], [], []>} : vector<8x128xbf16>, vector<8x128xbf16>, vector<8x8xf32> -> vector<8x8xf32>
    %17 = vector.broadcast %9 : vector<8x1xf32> to vector<8x8xf32>
    %18 = vector.broadcast %15 : vector<1x8xf32> to vector<8x8xf32>
    %19 = arith.addf %17, %18 : vector<8x8xf32>
    %cst_14 = arith.constant 2.000000e+00 : f32
    %20 = vector.broadcast %cst_14 : f32 to vector<8x8xf32>
    %21 = arith.mulf %20, %16 : vector<8x8xf32>
    %22 = arith.subf %19, %21 : vector<8x8xf32>
    %cst_15 = arith.constant 0.000000e+00 : f32
    %23 = vector.broadcast %cst_15 : f32 to vector<8x8xf32>
    %24 = arith.maximumf %22, %23 : vector<8x8xf32>
    %25 = tpu.iota {dimensions = array<i32: 1>} : vector<8x8xi32>
    %26 = tpu.iota {dimensions = array<i32: 0>} : vector<8x8xi32>
    %27 = arith.subi %26, %25 : vector<8x8xi32>
    %28 = arith.subi %10, %0 : i32
    %29 = vector.broadcast %28 : i32 to vector<8x8xi32>
    %30 = arith.cmpi eq, %27, %29 : vector<8x8xi32>
    %cst_16 = arith.constant 0.000000e+00 : f32
    %31 = vector.broadcast %cst_16 : f32 to vector<8x8xf32>
    %32 = arith.select %30, %31, %24 : vector<8x8xi1>, vector<8x8xf32>
    %cst_17 = arith.constant dense<0x7F800000> : vector<8xf32>
    %33 = vector.multi_reduction <minimumf>, %32, %cst_17 [1] : vector<8x8xf32> to vector<8xf32>
    %34 = vector.shape_cast %33 : vector<8xf32> to vector<8x1xf32>
    %35 = vector.broadcast %34 : vector<8x1xf32> to vector<8x8xf32>
    %36 = arith.cmpf oeq, %32, %35 : vector<8x8xf32>
    %c1073741824_i32 = arith.constant 1073741824 : i32
    %37 = vector.broadcast %c1073741824_i32 : i32 to vector<8x8xi32>
    %38 = arith.select %36, %25, %37 : vector<8x8xi1>, vector<8x8xi32>
    %cst_18 = arith.constant dense<2147483647> : vector<8xi32>
    %39 = vector.multi_reduction <minsi>, %38, %cst_18 [1] : vector<8x8xi32> to vector<8xi32>
    %40 = vector.shape_cast %39 : vector<8xi32> to vector<8x1xi32>
    %41 = vector.broadcast %10 : i32 to vector<8x1xi32>
    %42 = arith.addi %40, %41 : vector<8x1xi32>
    %43 = vector.broadcast %40 : vector<8x1xi32> to vector<8x8xi32>
    %44 = arith.cmpi eq, %25, %43 : vector<8x8xi32>
    %cst_19 = arith.constant 0x7F800000 : f32
    %45 = vector.broadcast %cst_19 : f32 to vector<8x8xf32>
    %46 = arith.select %44, %45, %32 : vector<8x8xi1>, vector<8x8xf32>
    %cst_20 = arith.constant dense<0x7F800000> : vector<8xf32>
    %47 = vector.multi_reduction <minimumf>, %46, %cst_20 [1] : vector<8x8xf32> to vector<8xf32>
    %48 = vector.shape_cast %47 : vector<8xf32> to vector<8x1xf32>
    %49 = vector.broadcast %48 : vector<8x1xf32> to vector<8x8xf32>
    %50 = arith.cmpf oeq, %46, %49 : vector<8x8xf32>
    %c1073741824_i32_21 = arith.constant 1073741824 : i32
    %51 = vector.broadcast %c1073741824_i32_21 : i32 to vector<8x8xi32>
    %52 = arith.select %50, %25, %51 : vector<8x8xi1>, vector<8x8xi32>
    %cst_22 = arith.constant dense<2147483647> : vector<8xi32>
    %53 = vector.multi_reduction <minsi>, %52, %cst_22 [1] : vector<8x8xi32> to vector<8xi32>
    %54 = vector.shape_cast %53 : vector<8xi32> to vector<8x1xi32>
    %55 = vector.broadcast %10 : i32 to vector<8x1xi32>
    %56 = arith.addi %54, %55 : vector<8x1xi32>
    %57 = vector.broadcast %54 : vector<8x1xi32> to vector<8x8xi32>
    %58 = arith.cmpi eq, %25, %57 : vector<8x8xi32>
    %cst_23 = arith.constant 0x7F800000 : f32
    %59 = vector.broadcast %cst_23 : f32 to vector<8x8xf32>
    %60 = arith.select %58, %59, %46 : vector<8x8xi1>, vector<8x8xf32>
    %cst_24 = arith.constant dense<0x7F800000> : vector<8xf32>
    %61 = vector.multi_reduction <minimumf>, %60, %cst_24 [1] : vector<8x8xf32> to vector<8xf32>
    %62 = vector.shape_cast %61 : vector<8xf32> to vector<8x1xf32>
    %63 = vector.broadcast %62 : vector<8x1xf32> to vector<8x8xf32>
    %64 = arith.cmpf oeq, %60, %63 : vector<8x8xf32>
    %c1073741824_i32_25 = arith.constant 1073741824 : i32
    %65 = vector.broadcast %c1073741824_i32_25 : i32 to vector<8x8xi32>
    %66 = arith.select %64, %25, %65 : vector<8x8xi1>, vector<8x8xi32>
    %cst_26 = arith.constant dense<2147483647> : vector<8xi32>
    %67 = vector.multi_reduction <minsi>, %66, %cst_26 [1] : vector<8x8xi32> to vector<8xi32>
    %68 = vector.shape_cast %67 : vector<8xi32> to vector<8x1xi32>
    %69 = vector.broadcast %10 : i32 to vector<8x1xi32>
    %70 = arith.addi %68, %69 : vector<8x1xi32>
    %71 = tpu.concatenate %34, %48, %62 in 1 : vector<8x1xf32>, vector<8x1xf32>, vector<8x1xf32> -> vector<8x3xf32>
    %72 = tpu.concatenate %42, %56, %70 in 1 : vector<8x1xi32>, vector<8x1xi32>, vector<8x1xi32> -> vector<8x3xi32>
    %c0_i32_27 = arith.constant 0 : i32
    %73 = arith.cmpi eq, %arg2, %c0_i32_27 : i32
    %74 = arith.extui %73 : i1 to i32
    %c0_i32_28 = arith.constant 0 : i32
    %75 = arith.cmpi ne, %74, %c0_i32_28 : i32
    scf.if %75 {
      %c0_35 = arith.constant 0 : index
      %c0_36 = arith.constant 0 : index
      %82 = vector.load %arg9[%c0_35, %c0_36] : memref<8x128xf32, #tpu.memory_space<vmem>>, vector<8x3xf32>
      tpu.vector_store %arg9[%c0_35, %c0_36], %71 {strides = array<i32>} : memref<8x128xf32, #tpu.memory_space<vmem>>, vector<8x3xf32>,
      %c0_37 = arith.constant 0 : index
      %c0_38 = arith.constant 0 : index
      %83 = vector.load %arg10[%c0_37, %c0_38] : memref<8x128xi32, #tpu.memory_space<vmem>>, vector<8x3xi32>
      tpu.vector_store %arg10[%c0_37, %c0_38], %72 {strides = array<i32>} : memref<8x128xi32, #tpu.memory_space<vmem>>, vector<8x3xi32>,
    } else {
    }
    %c0_i32_29 = arith.constant 0 : i32
    %76 = arith.cmpi sgt, %arg2, %c0_i32_29 : i32
    %77 = arith.extui %76 : i1 to i32
    %c1073741824_i32_30 = arith.constant 1073741824 : i32
    %cst_31 = arith.constant 0x7F800000 : f32
    %c0_i32_32 = arith.constant 0 : i32
    %78 = arith.cmpi ne, %77, %c0_i32_32 : i32
    scf.if %78 {
      %c0_35 = arith.constant 0 : index
      %c0_36 = arith.constant 0 : index
      %82 = vector.load %arg9[%c0_35, %c0_36] : memref<8x128xf32, #tpu.memory_space<vmem>>, vector<8x3xf32>
      %c0_37 = arith.constant 0 : index
      %c0_38 = arith.constant 0 : index
      %83 = vector.load %arg10[%c0_37, %c0_38] : memref<8x128xi32, #tpu.memory_space<vmem>>, vector<8x3xi32>
      %84 = tpu.concatenate %82, %71 in 1 : vector<8x3xf32>, vector<8x3xf32> -> vector<8x6xf32>
      %85 = tpu.concatenate %83, %72 in 1 : vector<8x3xi32>, vector<8x3xi32> -> vector<8x6xi32>
      %86 = tpu.iota {dimensions = array<i32: 1>} : vector<8x6xi32>
      %cst_39 = arith.constant dense<0x7F800000> : vector<8xf32>
      %87 = vector.multi_reduction <minimumf>, %84, %cst_39 [1] : vector<8x6xf32> to vector<8xf32>
      %88 = vector.shape_cast %87 : vector<8xf32> to vector<8x1xf32>
      %89 = vector.broadcast %88 : vector<8x1xf32> to vector<8x6xf32>
      %90 = arith.cmpf oeq, %84, %89 : vector<8x6xf32>
      %91 = vector.broadcast %c1073741824_i32_30 : i32 to vector<8x6xi32>
      %92 = arith.select %90, %86, %91 : vector<8x6xi1>, vector<8x6xi32>
      %cst_40 = arith.constant dense<2147483647> : vector<8xi32>
      %93 = vector.multi_reduction <minsi>, %92, %cst_40 [1] : vector<8x6xi32> to vector<8xi32>
      %94 = vector.shape_cast %93 : vector<8xi32> to vector<8x1xi32>
      %95 = vector.broadcast %94 : vector<8x1xi32> to vector<8x6xi32>
      %96 = arith.cmpi eq, %86, %95 : vector<8x6xi32>
      %c0_i32_41 = arith.constant 0 : i32
      %97 = vector.broadcast %c0_i32_41 : i32 to vector<8x6xi32>
      %98 = arith.select %96, %85, %97 : vector<8x6xi1>, vector<8x6xi32>
      %cst_42 = arith.constant dense<0> : vector<8xi32>
      %99 = vector.multi_reduction <add>, %98, %cst_42 [1] : vector<8x6xi32> to vector<8xi32>
      %100 = vector.shape_cast %99 : vector<8xi32> to vector<8x1xi32>
      %101 = vector.broadcast %94 : vector<8x1xi32> to vector<8x6xi32>
      %102 = arith.cmpi eq, %86, %101 : vector<8x6xi32>
      %103 = vector.broadcast %cst_31 : f32 to vector<8x6xf32>
      %104 = arith.select %102, %103, %84 : vector<8x6xi1>, vector<8x6xf32>
      %cst_43 = arith.constant dense<0x7F800000> : vector<8xf32>
      %105 = vector.multi_reduction <minimumf>, %104, %cst_43 [1] : vector<8x6xf32> to vector<8xf32>
      %106 = vector.shape_cast %105 : vector<8xf32> to vector<8x1xf32>
      %107 = vector.broadcast %106 : vector<8x1xf32> to vector<8x6xf32>
      %108 = arith.cmpf oeq, %104, %107 : vector<8x6xf32>
      %109 = vector.broadcast %c1073741824_i32_30 : i32 to vector<8x6xi32>
      %110 = arith.select %108, %86, %109 : vector<8x6xi1>, vector<8x6xi32>
      %cst_44 = arith.constant dense<2147483647> : vector<8xi32>
      %111 = vector.multi_reduction <minsi>, %110, %cst_44 [1] : vector<8x6xi32> to vector<8xi32>
      %112 = vector.shape_cast %111 : vector<8xi32> to vector<8x1xi32>
      %113 = vector.broadcast %112 : vector<8x1xi32> to vector<8x6xi32>
      %114 = arith.cmpi eq, %86, %113 : vector<8x6xi32>
      %c0_i32_45 = arith.constant 0 : i32
      %115 = vector.broadcast %c0_i32_45 : i32 to vector<8x6xi32>
      %116 = arith.select %114, %85, %115 : vector<8x6xi1>, vector<8x6xi32>
      %cst_46 = arith.constant dense<0> : vector<8xi32>
      %117 = vector.multi_reduction <add>, %116, %cst_46 [1] : vector<8x6xi32> to vector<8xi32>
      %118 = vector.shape_cast %117 : vector<8xi32> to vector<8x1xi32>
      %119 = vector.broadcast %112 : vector<8x1xi32> to vector<8x6xi32>
      %120 = arith.cmpi eq, %86, %119 : vector<8x6xi32>
      %121 = vector.broadcast %cst_31 : f32 to vector<8x6xf32>
      %122 = arith.select %120, %121, %104 : vector<8x6xi1>, vector<8x6xf32>
      %cst_47 = arith.constant dense<0x7F800000> : vector<8xf32>
      %123 = vector.multi_reduction <minimumf>, %122, %cst_47 [1] : vector<8x6xf32> to vector<8xf32>
      %124 = vector.shape_cast %123 : vector<8xf32> to vector<8x1xf32>
      %125 = vector.broadcast %124 : vector<8x1xf32> to vector<8x6xf32>
      %126 = arith.cmpf oeq, %122, %125 : vector<8x6xf32>
      %127 = vector.broadcast %c1073741824_i32_30 : i32 to vector<8x6xi32>
      %128 = arith.select %126, %86, %127 : vector<8x6xi1>, vector<8x6xi32>
      %cst_48 = arith.constant dense<2147483647> : vector<8xi32>
      %129 = vector.multi_reduction <minsi>, %128, %cst_48 [1] : vector<8x6xi32> to vector<8xi32>
      %130 = vector.shape_cast %129 : vector<8xi32> to vector<8x1xi32>
      %131 = vector.broadcast %130 : vector<8x1xi32> to vector<8x6xi32>
      %132 = arith.cmpi eq, %86, %131 : vector<8x6xi32>
      %c0_i32_49 = arith.constant 0 : i32
      %133 = vector.broadcast %c0_i32_49 : i32 to vector<8x6xi32>
      %134 = arith.select %132, %85, %133 : vector<8x6xi1>, vector<8x6xi32>
      %cst_50 = arith.constant dense<0> : vector<8xi32>
      %135 = vector.multi_reduction <add>, %134, %cst_50 [1] : vector<8x6xi32> to vector<8xi32>
      %136 = vector.shape_cast %135 : vector<8xi32> to vector<8x1xi32>
      %137 = tpu.concatenate %88, %106, %124 in 1 : vector<8x1xf32>, vector<8x1xf32>, vector<8x1xf32> -> vector<8x3xf32>
      %c0_51 = arith.constant 0 : index
      %c0_52 = arith.constant 0 : index
      %138 = vector.load %arg9[%c0_51, %c0_52] : memref<8x128xf32, #tpu.memory_space<vmem>>, vector<8x3xf32>
      tpu.vector_store %arg9[%c0_51, %c0_52], %137 {strides = array<i32>} : memref<8x128xf32, #tpu.memory_space<vmem>>, vector<8x3xf32>,
      %139 = tpu.concatenate %100, %118, %136 in 1 : vector<8x1xi32>, vector<8x1xi32>, vector<8x1xi32> -> vector<8x3xi32>
      %c0_53 = arith.constant 0 : index
      %c0_54 = arith.constant 0 : index
      %140 = vector.load %arg10[%c0_53, %c0_54] : memref<8x128xi32, #tpu.memory_space<vmem>>, vector<8x3xi32>
      tpu.vector_store %arg10[%c0_53, %c0_54], %139 {strides = array<i32>} : memref<8x128xi32, #tpu.memory_space<vmem>>, vector<8x3xi32>,
    } else {
    }
    %c0_i32_33 = arith.constant 0 : i32
    %79 = arith.cmpi eq, %arg2, %c0_i32_33 : i32
    %80 = arith.extui %79 : i1 to i32
    %c0_i32_34 = arith.constant 0 : i32
    %81 = arith.cmpi ne, %80, %c0_i32_34 : i32
    scf.if %81 {
      %c0_35 = arith.constant 0 : index
      %c0_36 = arith.constant 0 : index
      %82 = vector.load %arg9[%c0_35, %c0_36] : memref<8x128xf32, #tpu.memory_space<vmem>>, vector<8x128xf32>
      %c0_37 = arith.constant 0 : index
      %c0_38 = arith.constant 0 : index
      %c0_39 = arith.constant 0 : index
      %83 = vector.load %arg7[%c0_37, %c0_38, %c0_39] : memref<1x8x128xf32, #tpu.memory_space<vmem>>, vector<1x8x128xf32>
      %84 = vector.shape_cast %83 : vector<1x8x128xf32> to vector<8x128xf32>
      %85 = vector.shape_cast %82 : vector<8x128xf32> to vector<1x8x128xf32>
      tpu.vector_store %arg7[%c0_37, %c0_38, %c0_39], %85 {strides = array<i32>} : memref<1x8x128xf32, #tpu.memory_space<vmem>>, vector<1x8x128xf32>,
      %c0_40 = arith.constant 0 : index
      %c0_41 = arith.constant 0 : index
      %86 = vector.load %arg10[%c0_40, %c0_41] : memref<8x128xi32, #tpu.memory_space<vmem>>, vector<8x128xi32>
      %c0_42 = arith.constant 0 : index
      %c0_43 = arith.constant 0 : index
      %c0_44 = arith.constant 0 : index
      %87 = vector.load %arg8[%c0_42, %c0_43, %c0_44] : memref<1x8x128xi32, #tpu.memory_space<vmem>>, vector<1x8x128xi32>
      %88 = vector.shape_cast %87 : vector<1x8x128xi32> to vector<8x128xi32>
      %89 = vector.shape_cast %86 : vector<8x128xi32> to vector<1x8x128xi32>
      tpu.vector_store %arg8[%c0_42, %c0_43, %c0_44], %89 {strides = array<i32>} : memref<1x8x128xi32, #tpu.memory_space<vmem>>, vector<1x8x128xi32>,
    } else {
    }
    return
  }
  func.func @transform_0(%arg0: i32, %arg1: i32, %arg2: i32) -> (i32, i32, i32) {
    %c0_i32 = arith.constant 0 : i32
    %c0_i32_0 = arith.constant 0 : i32
    return %arg0, %arg1, %c0_i32 : i32, i32, i32
  }
  func.func @transform_1(%arg0: i32, %arg1: i32, %arg2: i32) -> (i32, i32, i32) {
    %c0_i32 = arith.constant 0 : i32
    %c0_i32_0 = arith.constant 0 : i32
    return %arg0, %arg1, %c0_i32 : i32, i32, i32
  }
  func.func @transform_2(%arg0: i32, %arg1: i32, %arg2: i32) -> (i32, i32, i32) {
    %c0_i32 = arith.constant 0 : i32
    %c0_i32_0 = arith.constant 0 : i32
    return %arg0, %arg2, %c0_i32 : i32, i32, i32
  }
  func.func @transform_3(%arg0: i32, %arg1: i32, %arg2: i32) -> (i32, i32, i32) {
    %c0_i32 = arith.constant 0 : i32
    %c0_i32_0 = arith.constant 0 : i32
    return %arg0, %c0_i32, %arg2 : i32, i32, i32
  }
  func.func @transform_4(%arg0: i32, %arg1: i32, %arg2: i32) -> (i32, i32, i32) {
    %c0_i32 = arith.constant 0 : i32
    %c0_i32_0 = arith.constant 0 : i32
    return %arg0, %arg1, %c0_i32 : i32, i32, i32
  }
  func.func @transform_5(%arg0: i32, %arg1: i32, %arg2: i32) -> (i32, i32, i32) {
    %c0_i32 = arith.constant 0 : i32
    %c0_i32_0 = arith.constant 0 : i32
    return %arg0, %arg1, %c0_i32 : i32, i32, i32
  }
}

</mosaic_0001>

<bundles_post_ra>
// kernel: tpu_custom_call.1
= control target key start
LH: loop header
LB: loop body
LE: loop exit
PB: predicated region body
PF: predicated region fallthrough
CT: control target
= control target key end

     0   :  { %11 = vsyncpa [#allocation5], 0  ;;  %s1267_s0 = inlined_call_operand.vmem [shape: f32[2,8,128], index: 0, kind: input, shape index: {}]   ;;  %s1268_s1 = inlined_call_operand.vmem [shape: f32[2,8,1], index: 1, kind: input, shape index: {}]   ;;  %s1269_s2 = inlined_call_operand.hbm [shape: f32[2,8,128], index: 2, kind: input, shape index: {}]   ;;  %s1270_s3 = inlined_call_operand.vmem [shape: f32[2,1,8], index: 3, kind: input, shape index: {}]   ;;  %s1271_s4 = inlined_call_operand.hbm [shape: f32[2,8,128], index: 4, kind: output, shape index: {0}]   ;;  %s1272_s5 = inlined_call_operand.hbm [shape: s32[2,8,128], index: 5, kind: output, shape index: {1}]  }
   0x1   :  { %13 = vsyncpa [#allocation5 + $0x1], 0 }
   0x2   :  { %14 = vsyncpa [#allocation6], 0 }
   0x3   :  { %16 = vsyncpa [#allocation6 + $0x1], 0 }
   0x4   :  { %17 = vsyncpa [#allocation9], 0 }
   0x5   :  { %19 = vsyncpa [#allocation9 + $0x1], 0  ;;  %s1089_s18 = smov 0   ;;  %s1091_s19 = smov 0  }
   0x6   :  { %s1093_s20 = smov 0   ;;  %s1095_s21 = smov 0  }
   0x7   :  { %s1097_s22 = smov 0   ;;  %s1099_s23 = smov 0  }
   0x8 LB: > { %s822_s24 = sadd.s32 4294967295, %s1055_s23   ;;  %s823_s25 = sadd.s32 4294967294, %s1055_s23   ;;  %s1055_s23 = sphi %s1099_s23, %s25_s23   ;;  %s1051_s22 = sphi %s1097_s22, %s1281_s22   ;;  %s1047_s21 = sphi %s1095_s21, %s1280_s21   ;;  %s1043_s20 = sphi %s1093_s20, %s1279_s20   ;;  %s1039_s19 = sphi %s1091_s19, %s1278_s19   ;;  %s1035_s18 = sphi %s1089_s18, %s1277_s18  }
   0x9   : > { %s44_s26 = sadd.s32 1, %s1051_s22  ;;  %s109_s27 = sadd.s32 1, %s1043_s20 }
   0xa   : > { %p46_p0 = scmp.ge.s32.totalorder %s44_s26, 2  ;;  %p116_p1 = scmp.ne.s32.totalorder %s1043_s20, %s1039_s19 }
   0xb   : > { %p117_p2 = scmp.eq.s32.totalorder %s1055_s23, 0  ;;  %p122_p3 = scmp.ne.s32.totalorder %s1039_s19, %s1035_s18 }
   0xc   : > { %s1283_s26 = smov (%p46_p0, %s44_s26), 0  ;;  %p123_p5 = scmp.eq.s32.totalorder %s822_s24, 0 }
   0xd   : > { %p1130_p4 = por %p117_p2, %p116_p1  ;;  %s104_s29 = ssub.s32 %s1051_s22, %s1283_s26 }
   0xe   : > { %p176_p6 = scmp.eq.s32.totalorder %s822_s24, 1  ;;  %p107_p7 = scmp.eq.s32.totalorder %s104_s29, 0 }
   0xf   : > { %p1136_p8 = por %p123_p5, %p122_p3  ;;  %p182_p10 = scmp.eq.s32.totalorder %s823_s25, 1 }
  0x10   : > { %p1140_p9 = por %p176_p6, %p116_p1  ;;  %p825_p12 = scmp.ge.s32.totalorder %s1055_s23, 2 }
  0x11   : > { %s1145_s7 = scalar_select %p107_p7, %s1043_s20, %s109_s27  }
  0x12   : > { %p1147_p11 = por %p182_p10, %p122_p3  ;;  %p857_p13 = scmp.lt.s32.totalorder %s1055_s23, 2 }
  0x13   : > { %s250_s9 = sand.u32 1, %s1043_s20   ;;  %s827_s11 = sshll.u32 %s1051_s22, 3 }
  0x14   : > { %s826_s10 = sshll.u32 %s250_s9, 3  ;;  %s259_s14 = scalar_lea.hbm %s1269_s2, %s827_s11 }
  0x15   : > { %s254_s15 = scalar_lea.vmem [#allocation4], %s826_s10  ;;  %s261_s17 = sshll.u32 %s259_s14, 4  ;;  %s262_s17 = int_to_ptr.hbm [resolvable:$true] %s261_s17 }
  0x16   : > { %s263_s16 = sshll.u32 %s254_s15, 4  ;;  %p847_p0 = pnand %p857_p13, %p1130_p4  ;;  %s264_s16 = int_to_ptr.vmem [resolvable:$true] %s263_s16 }
  0x17   : > { %p828_p1 = scmp.ge.s32.totalorder %s1055_s23, 1  ;;  %p277_p2 = scmp.lt.s32.totalorder %s1055_s23, 3 }
  0x18   : > { %s251_s24 = scalar_lea.sflag [#allocation5], %s250_s9 }
  0x19   : > { %849 = dma.hbm_to_vmem [thread:$0]  (!%p847_p0), %s262_s17, 128, %s264_s16, %s251_s24  }
  0x1a   : > { %p278_p3 = pnand %p828_p1, %p277_p2 }
  0x1b   : > { %s1163_s25 = sand.u32 (!%p278_p3), 1, %s1039_s19  }
  0x1c   : > { %281 = sbr.rel (%p278_p3) target bundleno = 1280 (0x500), region = 36  ;;  %s1166_s27 = sshll.u32 (!%p278_p3), %s1163_s25, 3 }
  0x1d   : > { %s284_s29 = scalar_lea.sflag (!%p278_p3), [#allocation5], %s1163_s25  ;;  %s287_s10 = scalar_lea.vmem (!%p278_p3), [#allocation4], %s1166_s27 }
  0x21   : > { %1022 = dma.done.wait (%p1136_p8), %s284_s29, 128  }
  0x22   : > { %1024 = vsyncadd (%p1136_p8), %s284_s29, 4294967168  ;;  %p340_p4 = scmp.lt.s32.totalorder %s1047_s21, 1  ;;  %v1057_v0 = vmov 0   ;;  %v372_v1 = vld [vmem:[%s287_s10] sm:$0xff]  ;;  %v400_v6 = vlaneseq  ;;  %vm409_vm1 = vcmask 64512   ;;  %v1058_v45 = vmov inf  }
  0x23   : > { %909 = vset.pattern.permute.xlu0 %v1057_v0  ;;  %368 = vst [vmem:[#allocation3] sm:$0xff] %v1057_v0  ;;  %v373_v3 = vpack.c.bf16 %v372_v1, %v372_v1  ;;  %vm478_vm8 = vcmask 7168   ;;  %vm480_vm9 = vcmask 15360   ;;  %vm487_vm10 = vcmask 23552   ;;  %s332_s29 = scalar_lea.vmem [#allocation7], %s1166_s27  ;;  %s836_s10 = sshll.u32 %s1047_s21, 3 }
  0x24   : > { %s341_s28 = scalar_select %p340_p4, %s1047_s21, 1  ;;  %v1185_v9 = vand.u32 127, %v400_v6  ;;  %v403_v10 = vshrl.u32 %v400_v6, 7  ;;  %367 = vst [vmem:[#allocation2] sm:$0xff] %v1058_v45 }
  0x25   : > { %382 = vmatpush.bf16.xpose.msra.mxu0 %v373_v3  ;;  %s643_s11 = scalar_lea.hbm %s1271_s4, %s836_s10  ;;  %s645_s12 = sshll.u32 %s332_s29, 4  ;;  %s646_s12 = int_to_ptr.vmem [resolvable:$true] %s645_s12 }
  0x26   : > { %s832_s9 = sshll.u32 %s341_s28, 3  ;;  %s359_s24 = scalar_lea.vmem %s1270_s3, %s341_s28  ;;  %v404_v13 = vsub.s32 %v403_v10, %v1185_v9 }
  0x27   : > { %s353_s13 = scalar_lea.vmem %s1268_s1, %s832_s9  ;;  %s346_s16 = scalar_lea.vmem %s1267_s0, %s832_s9  ;;  %v910_v7 = vld [vmem:[%s359_s24] ss:$0 sm:$0xff] }
  0x28   : > { %v371_v2 = vld [vmem:[%s353_s13] sm:$0xff]  ;;  %vm407_vm0 = vcmp.eq.s32.totalorder %v404_v13, 0  ;;  %s647_s13 = sshll.u32 %s643_s11, 4  ;;  %s627_s14 = scalar_lea.sflag [#allocation6], %s1163_s25  ;;  %s648_s13 = int_to_ptr.hbm [resolvable:$true] %s647_s13 }
  0x29   : > { %390 = vperm.xlu0 %909, %v371_v2   ;;  %v369_v4 = vld [vmem:[%s346_s16] sm:$0xff]  ;;  %s955_s15 = sshra.s32 %s648_s13, 4  ;;  %s961_s24 = scalar_lea.hbm %s1271_s4, 16  ;;  %s956_s15 = int_to_ptr.hbm [resolvable:$true] %s955_s15 }
  0x2a   : > { %v370_v5 = vpack.c.bf16 %v369_v4, %v369_v4  ;;  %s957_s16 = scalar_lea.hbm %s956_s15, 8  ;;  %p962_p8 = scmp.lt.s32.totalorder %s956_s15, %s1271_s4 }
  0x2b   : > { %p958_p5 = scmp.ne.s32.totalorder %s956_s15, %s957_s16  ;;  %p963_p10 = scmp.lt.s32.totalorder %s961_s24, %s957_s16 }
  0x2c   : > { %383 = vmatmul.bf16.vlgmr.msra.gmra.mxu0 %v370_v5 }
  0x2d   : > { %p959_p6 = pnand %p958_p5, %p1140_p9  ;;  %p964_p13 = por %p963_p10, %p962_p8 }
  0x2f   : > { %p960_p7 = pneg %p959_p6 }
  0x31   : > { %p965_p0 = pnand %p964_p13, %p960_p7 }
  0x9b   : > { %v391_v8 = vpop.permute.xlu0 %390 }
  0x9c   : > { %v396_v11 = vadd.f32 %v910_v7, %v391_v8 }
  0xa9   : > { %v384_v12 = vpop.f32.mrf.mxu0 }
  0xaa   : > { %v397_v14 = vmul.f32 2.0, %v384_v12 }
  0xac   : > { %v398_v15 = vsub.f32 %v396_v11, %v397_v14 }
  0xae   : > { %v399_v16 = vmax.f32 %v398_v15, 0.0 }
  0xb0   : > { %v408_v17 = vsel %vm407_vm0, 0.0, %v399_v16 }
  0xb1   : > { %v386_v18 = vpop.f32.mrf.mxu0  ;;  %v410_v19 = vsel %vm409_vm1, %v408_v17, inf }
  0xb2   : > { %411 = vmin.xlane.f32.xlu0 %v410_v19 }
 0x125   : > { %v412_v20 = vpop.xlane.xlu0 %411 }
 0x126   : > { %vm413_vm2 = vcmp.eq.f32.partialorder %v408_v17, %v412_v20 }
 0x127   : > { %v414_v21 = vsel %vm413_vm2, %v1185_v9, 1073741824 }
 0x128   : > { %v415_v22 = vsel %vm409_vm1, %v414_v21, 2147483647 }
 0x129   : > { %v417_v23 = vshra.s32 %v415_v22, 16  ;;  %v416_v25 = vand.u32 65535, %v415_v22 }
 0x12b   : > { %v419_v24 = vcvt.s32.f32 %v417_v23  ;;  %v418_v27 = vcvt.s32.f32 %v416_v25 }
 0x12d   : > { %420 = vmin.xlane.f32.xlu1 %v419_v24 }
 0x1a0   : > { %v421_v26 = vpop.xlane.xlu1 %420 }
 0x1a1   : > { %vm422_vm3 = vcmp.eq.f32.partialorder %v419_v24, %v421_v26  ;;  %v427_v29 = vcvt.f32.s32 %v421_v26 }
 0x1a2   : > { %v423_v28 = vsel %vm422_vm3, %v418_v27, inf }
 0x1a3   : > { %424 = vmin.xlane.f32.xlu1 %v423_v28  ;;  %v428_v31 = vshll.u32 %v427_v29, 16 }
 0x216   : > { %v425_v30 = vpop.xlane.xlu1 %424 }
 0x217   : > { %v426_v32 = vcvt.f32.s32 %v425_v30 }
 0x219   : > { %v1191_v33 = vadd.s32 %v428_v31, %v426_v32 }
 0x21b   : > { %vm432_vm4 = vcmp.eq.s32.totalorder %v1185_v9, %v1191_v33 }
 0x21c   : > { %v433_v34 = vsel %vm432_vm4, inf, %v408_v17 }
 0x21d   : > { %v434_v35 = vsel %vm409_vm1, %v433_v34, inf }
 0x21e   : > { %435 = vmin.xlane.f32.xlu2 %v434_v35 }
 0x291   : > { %v436_v36 = vpop.xlane.xlu2 %435 }
 0x292   : > { %vm437_vm5 = vcmp.eq.f32.partialorder %v433_v34, %v436_v36  ;;  %v479_v53 = vsel %vm478_vm8, %v412_v20, %v436_v36 }
 0x293   : > { %v438_v37 = vsel %vm437_vm5, %v1185_v9, 1073741824 }
 0x294   : > { %v439_v38 = vsel %vm409_vm1, %v438_v37, 2147483647 }
 0x295   : > { %v441_v39 = vshra.s32 %v439_v38, 16  ;;  %v440_v41 = vand.u32 65535, %v439_v38 }
 0x297   : > { %v443_v40 = vcvt.s32.f32 %v441_v39  ;;  %v442_v43 = vcvt.s32.f32 %v440_v41 }
 0x299   : > { %444 = vmin.xlane.f32.xlu2 %v443_v40 }
 0x30c   : > { %v445_v42 = vpop.xlane.xlu2 %444 }
 0x30d   : > { %vm446_vm6 = vcmp.eq.f32.partialorder %v443_v40, %v445_v42  ;;  %v451_v46 = vcvt.f32.s32 %v445_v42 }
 0x30e   : > { %v447_v44 = vsel %vm446_vm6, %v442_v43, inf }
 0x30f   : > { %448 = vmin.xlane.f32.xlu1 %v447_v44  ;;  %v452_v48 = vshll.u32 %v451_v46, 16 }
 0x382   : > { %v449_v47 = vpop.xlane.xlu1 %448 }
 0x383   : > { %v450_v49 = vcvt.f32.s32 %v449_v47 }
 0x385   : > { %v453_v50 = vadd.s32 %v452_v48, %v450_v49 }
 0x387   : > { %vm455_vm7 = vcmp.eq.s32.totalorder %v1185_v9, %v453_v50 }
 0x388   : > { %v456_v51 = vsel %vm455_vm7, inf, %v433_v34 }
 0x389   : > { %v457_v52 = vsel %vm409_vm1, %v456_v51, inf }
 0x38a   : > { %458 = vmin.xlane.f32.xlu2 %v457_v52 }
 0x3fd   : > { %v459_v54 = vpop.xlane.xlu2 %458 }
 0x3fe   : > { %vm460_vm11 = vcmp.eq.f32.partialorder %v456_v51, %v459_v54  ;;  %v481_v55 = vsel %vm480_vm9, %v479_v53, %v459_v54 }
 0x3ff   : > { %v461_v56 = vsel %vm460_vm11, %v1185_v9, 1073741824  ;;  %488 = vst.msk [vmem:[#allocation2] sm:$0xff] %vm487_vm10, %v481_v55 }
 0x400   : > { %v462_v57 = vsel %vm409_vm1, %v461_v56, 2147483647 }
 0x401   : > { %v464_v58 = vshra.s32 %v462_v57, 16  ;;  %v463_v61 = vand.u32 65535, %v462_v57 }
 0x403   : > { %v466_v59 = vcvt.s32.f32 %v464_v58  ;;  %v465_v63 = vcvt.s32.f32 %v463_v61 }
 0x405   : > { %467 = vmin.xlane.f32.xlu1 %v466_v59 }
 0x406   : > { %v622_v60 = vld [vmem:[#allocation2] sm:$0xff] }
 0x407   : > { %623 = vst [vmem:[%s332_s29] sm:$0xff] %v622_v60 }
 0x478   : > { %v468_v62 = vpop.xlane.xlu1 %467 }
 0x479   : > { %968 = shalt.err (!%p965_p0)
}
 0x47a   : > { %842 = dma.vmem_to_hbm [thread:$0]  (%p1140_p9), %s646_s12, 128, %s648_s13, %s627_s14   ;;  %vm469_vm12 = vcmp.eq.f32.partialorder %v466_v59, %v468_v62  ;;  %v474_v1 = vcvt.f32.s32 %v468_v62  ;;  %v482_v6 = vsel %vm478_vm8, %v1191_v33, %v453_v50 }
 0x47b   : > { %v470_v0 = vsel %vm469_vm12, %v465_v63, inf  ;;  %s658_s12 = scalar_lea.hbm %s1272_s5, %s836_s10  ;;  %s339_s13 = scalar_lea.vmem [#allocation8], %s1166_s27 }
 0x47c   : > { %471 = vmin.xlane.f32.xlu2 %v470_v0  ;;  %v475_v3 = vshll.u32 %v474_v1, 16  ;;  %s660_s14 = sshll.u32 %s339_s13, 4  ;;  %s662_s15 = sshll.u32 %s658_s12, 4  ;;  %s661_s14 = int_to_ptr.vmem [resolvable:$true] %s660_s14  ;;  %s663_s15 = int_to_ptr.hbm [resolvable:$true] %s662_s15 }
 0x47d   : > { %s632_s16 = scalar_lea.sflag [#allocation9], %s1163_s25  ;;  %s983_s30 = sshra.s32 %s663_s15, 4  ;;  %s984_s30 = int_to_ptr.hbm [resolvable:$true] %s983_s30 }
 0x47e   : > { %s985_s17 = scalar_lea.hbm %s984_s30, 8  ;;  %s989_s28 = scalar_lea.hbm %s1272_s5, 16 }
 0x47f   : > { %p986_p1 = scmp.ne.s32.totalorder %s984_s30, %s985_s17  ;;  %p990_p4 = scmp.lt.s32.totalorder %s984_s30, %s1272_s5 }
 0x480   : > { %p991_p5 = scmp.lt.s32.totalorder %s989_s28, %s985_s17 }
 0x481   : > { %p987_p2 = pnand %p986_p1, %p1140_p9 }
 0x482   : > { %p992_p6 = por %p991_p5, %p990_p4 }
 0x483   : > { %p988_p3 = pneg %p987_p2 }
 0x485   : > { %p993_p7 = pnand %p992_p6, %p988_p3 }
 0x4ef   : > { %v472_v2 = vpop.xlane.xlu2 %471 }
 0x4f0   : > { %v473_v4 = vcvt.f32.s32 %v472_v2 }
 0x4f2   : > { %v476_v5 = vadd.s32 %v475_v3, %v473_v4 }
 0x4f4   : > { %v483_v7 = vsel %vm480_vm9, %v482_v6, %v476_v5 }
 0x4f5   : > { %489 = vst.msk [vmem:[#allocation3] sm:$0xff] %vm487_vm10, %v483_v7 }
 0x4fc   : > { %v624_v8 = vld [vmem:[#allocation3] sm:$0xff] }
 0x4fd   : > { %625 = vst [vmem:[%s339_s13] sm:$0xff] %v624_v8 }
 0x4fe   : > { %996 = shalt.err (!%p993_p7)
}
 0x4ff   : > { %843 = dma.vmem_to_hbm [thread:$0]  (%p1140_p9), %s661_s14, 128, %s663_s15, %s632_s16  }
 0x500 PF: > { %s674_s25 = sand.u32 1, %s1035_s18   ;;  %p851_p8 = pnand %p825_p12, %p1147_p11 }
 0x501   : > { %s675_s9 = scalar_lea.sflag [#allocation6], %s674_s25 }
 0x502   : > { %p852_p10 = pneg %p851_p8 }
 0x504   : > { %1026 = dma.done.wait (%p852_p10), %s675_s9, 128  }
 0x505   : > { %1028 = vsyncadd (%p852_p10), %s675_s9, 4294967168  ;;  %s685_s29 = scalar_lea.sflag [#allocation9], %s674_s25 }
 0x506   : > { %1030 = dma.done.wait (%p852_p10), %s685_s29, 128  }
 0x507   : > { %1032 = vsyncadd (%p852_p10), %s685_s29, 4294967168  ;;  %s25_s23 = sadd.s32 1, %s1055_s23   ;;  %s1277_s18 = smov %s1039_s19 }
 0x508   : > { %p22_p13 = scmp.ge.s32.totalorder %s25_s23, 4   ;;  %s1278_s19 = smov %s1043_s20 }
 0x509   : > { %s1279_s20 = smov %s1145_s7  ;;  %s1280_s21 = smov %s1051_s22 }
 0x50a   : > { %s1281_s22 = smov %s1283_s26  ;;  %24 = sbr.rel (!%p22_p13) target bundleno = 8 (0x8), region = 123 }
 0x50f   :  { %691 = vsyncpa [#allocation5], 1 }
 0x510   :  { %693 = vsyncpa [#allocation5 + $0x1], 1 }
 0x511   :  { %694 = vsyncpa [#allocation6], 1 }
 0x512   :  { %696 = vsyncpa [#allocation6 + $0x1], 1 }
 0x513   :  { %697 = vsyncpa [#allocation9], 1 }
 0x514   :  { %699 = vsyncpa [#allocation9 + $0x1], 1 }

</bundles_post_ra>
